<compile_context>
chip_gen: v5e
topology: v5e:2x2
jax: 0.10.0
libtpu: 0.0.40
codegen_flags: <defaults>
</compile_context>

<pallas_src>
import functools

import jax
import jax.numpy as jnp
from jax.experimental import pallas as pl
from jax.experimental.pallas import tpu as pltpu


def _round_up(n: int, m: int) -> int:
    return ((n + m - 1) // m) * m


def _linear_kernel(x_ref, w_ref, b_ref, o_ref):
    # MXU matmul + VPU bias add.
    y = jnp.dot(x_ref[...], w_ref[...], preferred_element_type=jnp.float32)
    o_ref[...] = (y + b_ref[...]).astype(o_ref.dtype)


def _linear_dropout_kernel(x_ref, w_ref, b_ref, bits_ref, o_ref, *, threshold, scale):
    # MXU matmul + bias, then inverted dropout via integer-threshold compare:
    # keep iff bits >= round(p * 2^32)  =>  P(keep) = 1 - p.
    y = jnp.dot(x_ref[...], w_ref[...], preferred_element_type=jnp.float32)
    y = y + b_ref[...]
    keep = bits_ref[...] >= jnp.uint32(threshold)
    o_ref[...] = jnp.where(keep, y * jnp.float32(scale), jnp.float32(0.0)).astype(
        o_ref.dtype
    )


def simple_classifier_forward(
    x, weight, bias, *, dropout_p, training, rng_key=None, block_batch=256
):
    """Forward pass of SimpleClassifier (Linear -> Dropout).

    x:      (batch, in_dim)   float32
    weight: (in_dim, out_dim) float32   (transposed vs. PyTorch storage)
    bias:   (out_dim,)        float32
    """
    batch, in_dim = x.shape
    out_dim = weight.shape[1]
    dtype = x.dtype
    p = float(dropout_p)

    # Lane-dense output: pad out_dim up to a multiple of 128 so stores are
    # full-width vst instead of masked partial stores; slice off afterwards.
    out_p = max(128, _round_up(out_dim, 128))
    # Batch tile: multiple of 8 sublanes, capped so (2x x-tile + 2x out-tile
    # + weight) stays comfortably under scoped VMEM even on v7x (64 MiB).
    tb = min(int(block_batch), _round_up(batch, 8))
    batch_p = _round_up(batch, tb)
    grid = (batch_p // tb,)

    x_p = x if batch_p == batch else jnp.pad(x, ((0, batch_p - batch), (0, 0)))
    w_p = weight if out_p == out_dim else jnp.pad(weight, ((0, 0), (0, out_p - out_dim)))
    b_p = bias.reshape(1, out_dim)
    if out_p != out_dim:
        b_p = jnp.pad(b_p, ((0, 0), (0, out_p - out_dim)))

    x_spec = pl.BlockSpec((tb, in_dim), lambda i: (i, 0))       # batch-tiled
    w_spec = pl.BlockSpec((in_dim, out_p), lambda i: (0, 0))    # VMEM-resident
    b_spec = pl.BlockSpec((1, out_p), lambda i: (0, 0))         # VMEM-resident
    o_spec = pl.BlockSpec((tb, out_p), lambda i: (i, 0))

    compiler_params = pltpu.CompilerParams(dimension_semantics=("parallel",))

    use_dropout = bool(training) and p > 0.0
    if use_dropout and p >= 1.0:
        # PyTorch nn.Dropout(p=1) zeroes everything.
        return jnp.zeros((batch, out_dim), dtype)

    if use_dropout:
        if rng_key is None:
            rng_key = jax.random.PRNGKey(0)
        threshold = min(int(round(p * 2.0 ** 32)), 2 ** 32 - 1)
        scale = 1.0 / (1.0 - p)
        # Random bits generated once over the whole padded output -> distinct
        # mask per tile / per call (fresh key per training step).
        bits = jax.random.bits(rng_key, (batch_p, out_p), dtype=jnp.uint32)
        kernel = functools.partial(
            _linear_dropout_kernel, threshold=threshold, scale=scale
        )
        out_padded = pl.pallas_call(
            kernel,
            out_shape=jax.ShapeDtypeStruct((batch_p, out_p), dtype),
            grid=grid,
            in_specs=[x_spec, w_spec, b_spec,
                      pl.BlockSpec((tb, out_p), lambda i: (i, 0))],
            out_specs=o_spec,
            compiler_params=compiler_params,
        )(x_p, w_p, b_p, bits)
    else:
        out_padded = pl.pallas_call(
            _linear_kernel,
            out_shape=jax.ShapeDtypeStruct((batch_p, out_p), dtype),
            grid=grid,
            in_specs=[x_spec, w_spec, b_spec],
            out_specs=o_spec,
            compiler_params=compiler_params,
        )(x_p, w_p, b_p)

    return out_padded[:batch, :out_dim]


if __name__ == "__main__":
    # Small shapes consistent with the module: batch=8, in_dim=32, out_dim=16.
    batch, in_dim, out_dim = 8, 32, 16
    dropout_p = 0.5

    root = jax.random.PRNGKey(0)
    kx, kw, kb, kdrop = jax.random.split(root, 4)

    x = jax.random.normal(kx, (batch, in_dim), dtype=jnp.float32)
    # Deterministic init mimicking nn.Linear's uniform(-1/sqrt(in_dim), 1/sqrt(in_dim)).
    bound = 1.0 / (in_dim ** 0.5)
    weight = jax.random.uniform(
        kw, (in_dim, out_dim), dtype=jnp.float32, minval=-bound, maxval=bound
    )
    bias = jax.random.uniform(
        kb, (out_dim,), dtype=jnp.float32, minval=-bound, maxval=bound
    )

    # Eval-mode forward (dropout is identity) — check against pure-JAX reference.
    out_eval = simple_classifier_forward(
        x, weight, bias, dropout_p=dropout_p, training=False
    )
    out_eval = jax.block_until_ready(out_eval)
    ref = x @ weight + bias
    assert out_eval.shape == (batch, out_dim)
    assert jnp.allclose(out_eval, ref, atol=1e-5, rtol=1e-5), "eval-mode mismatch"

    # Training-mode forward (inverted dropout): every element must be either 0
    # or the eval value scaled by 1/(1-p).
    out_train = simple_classifier_forward(
        x, weight, bias, dropout_p=dropout_p, training=True, rng_key=kdrop
    )
    out_train = jax.block_until_ready(out_train)
    assert out_train.shape == (batch, out_dim)
    scaled = ref * (1.0 / (1.0 - dropout_p))
    ok = jnp.where(
        out_train == 0.0, True, jnp.isclose(out_train, scaled, atol=1e-5, rtol=1e-5)
    )
    assert bool(jnp.all(ok)), "training-mode dropout mismatch"

    print("KERNEL_OK")
</pallas_src>

<mosaic_0001>
module attributes {stable_mosaic.version = 11 : i64} {
  func.func @_linear_kernel(%arg0: i32, %arg1: memref<8x32xf32, #tpu.memory_space<vmem>>, %arg2: memref<32x128xf32, #tpu.memory_space<vmem>>, %arg3: memref<1x128xf32, #tpu.memory_space<vmem>>, %arg4: memref<8x128xf32, #tpu.memory_space<vmem>>) attributes {dimension_semantics = [#tpu.dimension_semantics<parallel>], iteration_bounds = array<i64: 1>, scalar_prefetch = 0 : i64, scratch_operands = 0 : i64, tpu.core_type = #tpu.core_type<tc>, window_params = [{transform_indices = @transform_0, window_bounds = array<i64: 8, 32>}, {pipeline_mode = #tpu.pipeline_mode<synchronous>, transform_indices = @transform_1, window_bounds = array<i64: 32, 128>}, {pipeline_mode = #tpu.pipeline_mode<synchronous>, transform_indices = @transform_2, window_bounds = array<i64: 1, 128>}, {transform_indices = @transform_3, window_bounds = array<i64: 8, 128>}]} {
    %c0 = arith.constant 0 : index
    %c0_0 = arith.constant 0 : index
    %0 = vector.load %arg1[%c0, %c0_0] : memref<8x32xf32, #tpu.memory_space<vmem>>, vector<8x32xf32>
    %c0_1 = arith.constant 0 : index
    %c0_2 = arith.constant 0 : index
    %1 = vector.load %arg2[%c0_1, %c0_2] : memref<32x128xf32, #tpu.memory_space<vmem>>, vector<32x128xf32>
    %cst = arith.constant dense<0.000000e+00> : vector<8x128xf32>
    %2 = tpu.matmul %0, %1, %cst {dimension_numbers = #tpu.dot_dimension_numbers<[1], [0], [0], [1], [0, 0, 1, 1], [], []>} : vector<8x32xf32>, vector<32x128xf32>, vector<8x128xf32> -> vector<8x128xf32>
    %c0_3 = arith.constant 0 : index
    %c0_4 = arith.constant 0 : index
    %3 = vector.load %arg3[%c0_3, %c0_4] : memref<1x128xf32, #tpu.memory_space<vmem>>, vector<1x128xf32>
    %4 = vector.broadcast %3 : vector<1x128xf32> to vector<8x128xf32>
    %5 = arith.addf %2, %4 : vector<8x128xf32>
    %c0_5 = arith.constant 0 : index
    %c0_6 = arith.constant 0 : index
    %6 = vector.load %arg4[%c0_5, %c0_6] : memref<8x128xf32, #tpu.memory_space<vmem>>, vector<8x128xf32>
    tpu.vector_store %arg4[%c0_5, %c0_6], %5 {strides = array<i32>} : memref<8x128xf32, #tpu.memory_space<vmem>>, vector<8x128xf32>,
    return
  }
  func.func @transform_0(%arg0: i32) -> (i32, i32) {
    %c0_i32 = arith.constant 0 : i32
    %c0_i32_0 = arith.constant 0 : i32
    return %arg0, %c0_i32 : i32, i32
  }
  func.func @transform_1(%arg0: i32) -> (i32, i32) {
    %c0_i32 = arith.constant 0 : i32
    %c0_i32_0 = arith.constant 0 : i32
    %c0_i32_1 = arith.constant 0 : i32
    return %c0_i32, %c0_i32_0 : i32, i32
  }
  func.func @transform_2(%arg0: i32) -> (i32, i32) {
    %c0_i32 = arith.constant 0 : i32
    %c0_i32_0 = arith.constant 0 : i32
    %c0_i32_1 = arith.constant 0 : i32
    return %c0_i32, %c0_i32_0 : i32, i32
  }
  func.func @transform_3(%arg0: i32) -> (i32, i32) {
    %c0_i32 = arith.constant 0 : i32
    %c0_i32_0 = arith.constant 0 : i32
    return %arg0, %c0_i32 : i32, i32
  }
}

</mosaic_0001>

<bundles_post_ra>
// kernel: tpu_custom_call.1
= control target key start
LH: loop header
LB: loop body
LE: loop exit
PB: predicated region body
PF: predicated region fallthrough
CT: control target
= control target key end

     0   :  { %8 = vsyncpa [#allocation3], 0  ;;  %s219_s0 = inlined_call_operand.hbm [shape: f32[8,32], index: 0, kind: input, shape index: {}]   ;;  %s220_s1 = inlined_call_operand.hbm [shape: f32[32,128], index: 1, kind: input, shape index: {}]   ;;  %s221_s2 = inlined_call_operand.vmem [shape: f32[1,128], index: 2, kind: input, shape index: {}]   ;;  %s222_s3 = inlined_call_operand.hbm [shape: f32[8,128], index: 3, kind: output, shape index: {}]  }
   0x1   :  { %9 = vsyncpa [#allocation6], 0 }
   0x2   :  { %10 = vsyncpa [#allocation4], 0  ;;  %s16_s14 = sshll.u32 %s219_s0, 4  ;;  %s182_s15 = smov [#allocation2]   ;;  %s17_s14 = int_to_ptr.hbm [resolvable:$true] %s16_s14 }
   0x3   :  { %s18_s16 = sshll.u32 %s182_s15, 4  ;;  %s26_s19 = sshll.u32 %s220_s1, 4  ;;  %s19_s16 = int_to_ptr.vmem [resolvable:$true] %s18_s16  ;;  %s27_s19 = int_to_ptr.hbm [resolvable:$true] %s26_s19 }
   0x4   :  { %21 = dma.hbm_to_vmem [thread:$0]  %s17_s14, 128, %s19_s16, [#allocation3]  }
   0x5   :  { %s183_s20 = smov [#allocation5]   ;;  %s184_s22 = smov 128  }
   0x6   :  { %s28_s21 = sshll.u32 %s183_s20, 4  ;;  %s185_s23 = smov 8   ;;  %s29_s21 = int_to_ptr.vmem [resolvable:$true] %s28_s21 }
   0x7   :  { %34 = dma.hbm_to_vmem [thread:$0]  %s27_s19, 512, %s29_s21, [#allocation6], %s184_s22, %s184_s22, %s185_s23  }
   0x8   :  { %176 = dma.done.wait [#allocation3], 128  }
   0x9   :  { %177 = vsyncadd [#allocation3], 4294967168 }
   0xa   :  { %178 = dma.done.wait [#allocation6], 512  }
   0xb   :  { %179 = vsyncadd [#allocation6], 4294966784  ;;  %v49_v0 = vld [vmem:[#allocation5 + $0x18] sm:$0xff]  ;;  %v48_v1 = vld [vmem:[#allocation5 + $0x10] sm:$0xff]  ;;  %vm54_vm0 = vcmask 261120   ;;  %s186_s24 = smov [#allocation7]  }
   0xc   :  { %70 = vmatpush.msra.mxu0 %v49_v0  ;;  %v47_v2 = vld [vmem:[#allocation5 + $0x8] sm:$0xff]  ;;  %v46_v3 = vld [vmem:[#allocation5] sm:$0xff]  ;;  %v45_v4 = vld [vmem:[#allocation2] sm:$0xff]  ;;  %s84_s25 = sshll.u32 %s186_s24, 4  ;;  %s86_s28 = sshll.u32 %s222_s3, 4  ;;  %s85_s25 = int_to_ptr.vmem [resolvable:$true] %s84_s25  ;;  %s87_s28 = int_to_ptr.hbm [resolvable:$true] %s86_s28 }
   0xd   :  { %v103_v5 = vld [vmem:[%s221_s2] ss:$0 sm:$0xff] }
   0xe   :  { %71 = vmatpush.msra.mxu0 %v48_v1 }
  0x10   :  { %72 = vmatpush.msra.mxu0 %v47_v2 }
  0x12   :  { %73 = vmatpush.msra.mxu0 %v46_v3 }
  0x13   :  { %97 = vmatmul.msk.f32.vlgmr.msra.gmra.mxu0 %vm54_vm0, %v45_v4 }
  0x90   :  { %v75_v6 = vpop.f32.mrf.mxu0 }
  0x91   :  { %v76_v7 = vadd.f32 %v103_v5, %v75_v6 }
  0x93   :  { %78 = vst [vmem:[#allocation7] sm:$0xff] %v76_v7 }
  0x94   :  { %89 = dma.vmem_to_hbm [thread:$0]  %s85_s25, 128, %s87_s28, [#allocation4]  }
  0x95   :  { %180 = dma.done.wait [#allocation4], 128  }
  0x96   :  { %181 = vsyncadd [#allocation4], 4294967168 }
  0x97   :  { %94 = vsyncpa [#allocation3], 1 }
  0x98   :  { %95 = vsyncpa [#allocation6], 1 }
  0x99   :  { %96 = vsyncpa [#allocation4], 1 }

</bundles_post_ra>
